<compile_context>
chip_gen: v5e
topology: v5e:2x2
jax: 0.10.0
libtpu: 0.0.40
codegen_flags: <defaults>
</compile_context>

<pallas_src>
import jax
import jax.numpy as jnp
from jax.experimental import pallas as pl
from jax.experimental.pallas import tpu as pltpu

C_IN, H_IN, W_IN = 16, 10, 10
K_FULL = C_IN * H_IN * W_IN      # 1600 : flattened raw input (c, h, w) order
N_CONV = 120                     # conv2 output channels
N_FC1 = 84                       # first linear output
PAD = 128                        # lane-dense hidden / output width


def _lenet5b_kernel(x_ref, weff_ref, w12_ref, b_ref, out_ref):
    # Fused AvgPool2d(2) + Conv2d(16->120, k=5) + bias + Tanh:
    # (TB, 1600) @ (1600, 128) on the MXU; padded lanes give tanh(0) = 0.
    h = jnp.dot(x_ref[...], weff_ref[...], preferred_element_type=jnp.float32)
    h = jnp.tanh(h + b_ref[0:1, :])
    # Linear(120 -> 84) + Tanh (padded to 128x128; padded lanes stay zero).
    h = jnp.dot(h, w12_ref[0], preferred_element_type=jnp.float32)
    h = jnp.tanh(h + b_ref[1:2, :])
    # Linear(84 -> n_classes), lane-dense (TB, 128) store; sliced in wrapper.
    out = jnp.dot(h, w12_ref[1], preferred_element_type=jnp.float32)
    out_ref[...] = out + b_ref[2:3, :]


def lenet5_b_conv2_forward(x, kernel_params, n_classes, *, tb=512):
    """x: (B, 16, 10, 10) float32 NCHW.  Returns logits (B, n_classes)."""
    B = x.shape[0]
    assert x.shape[1:] == (C_IN, H_IN, W_IN)
    w_eff, w12, b = kernel_params

    # Single contiguous reshape of the raw input (no strided pooling slices).
    x2 = x.reshape(B, K_FULL)

    # Batch tiling: TB <= 512 keeps the double-buffered working set well under
    # v7x's 64 MiB VMEM while still amortizing per-step overhead on v5e/v6e.
    TB = min(tb, B)
    pad_b = (-B) % TB
    if pad_b:
        x2 = jnp.pad(x2, ((0, pad_b), (0, 0)))
    Bp = x2.shape[0]
    grid = (Bp // TB,)

    flops = 2 * Bp * (K_FULL * PAD + PAD * PAD + PAD * PAD)
    transcendentals = Bp * 2 * PAD
    bytes_accessed = 4 * (Bp * K_FULL + Bp * PAD
                          + int(w_eff.size) + int(w12.size) + int(b.size))

    out = pl.pallas_call(
        _lenet5b_kernel,
        out_shape=jax.ShapeDtypeStruct((Bp, PAD), jnp.float32),
        grid=grid,
        in_specs=[
            pl.BlockSpec((TB, K_FULL), lambda i: (i, 0)),       # x tile, pipelined
            pl.BlockSpec((K_FULL, PAD), lambda i: (0, 0)),      # folded conv weight (resident)
            pl.BlockSpec((2, PAD, PAD), lambda i: (0, 0, 0)),   # stacked fc1/fc2 weights (resident)
            pl.BlockSpec((3, PAD), lambda i: (0, 0)),           # stacked biases (resident)
        ],
        out_specs=pl.BlockSpec((TB, PAD), lambda i: (i, 0)),
        compiler_params=pltpu.CompilerParams(
            dimension_semantics=("parallel",),
            vmem_limit_bytes=32 * 1024 * 1024),
        cost_estimate=pl.CostEstimate(
            flops=flops,
            transcendentals=transcendentals,
            bytes_accessed=bytes_accessed),
    )(x2, w_eff, w12, b)

    return out[:B, :n_classes]


def init_raw_params(key, n_classes=10):
    """Deterministic init mirroring the PyTorch layer shapes (conv2 config)."""
    kcw, kcb, k1w, k1b, k2w, k2b = jax.random.split(key, 6)

    def u(k, shape, fan_in):
        bound = 1.0 / jnp.sqrt(jnp.float32(fan_in))
        return jax.random.uniform(k, shape, jnp.float32, -bound, bound)

    conv_w = u(kcw, (N_CONV, C_IN, 5, 5), C_IN * 5 * 5)   # PyTorch (O, C, KH, KW)
    conv_b = u(kcb, (N_CONV,), C_IN * 5 * 5)
    fc1_w = u(k1w, (N_FC1, N_CONV), N_CONV)               # PyTorch Linear (out, in)
    fc1_b = u(k1b, (N_FC1,), N_CONV)
    fc2_w = u(k2w, (n_classes, N_FC1), N_FC1)
    fc2_b = u(k2b, (n_classes,), N_FC1)
    return conv_w, conv_b, fc1_w, fc1_b, fc2_w, fc2_b


def prepare_kernel_params(raw_params):
    """One-time transform of PyTorch-layout params into kernel-ready slabs."""
    conv_w, conv_b, fc1_w, fc1_b, fc2_w, fc2_b = raw_params
    n_classes = fc2_w.shape[0]

    # Fold AvgPool2d(2) into the conv weight: each 5x5 conv tap is replicated
    # to its four 2x2 pooling-window positions of the raw 10x10 map, x 0.25.
    w = 0.25 * jnp.transpose(conv_w, (1, 2, 3, 0))        # (16, 5, 5, 120)
    w_eff = jnp.zeros((C_IN, H_IN, W_IN, N_CONV), jnp.float32)
    for dh in (0, 1):
        for dw in (0, 1):
            w_eff = w_eff.at[:, dh::2, dw::2, :].set(w)
    w_eff = w_eff.reshape(K_FULL, N_CONV)                 # (1600, 120)

    # Zero-pad every hidden / output width to 128 lanes.  Padded lanes carry
    # exactly zero through bias-add and tanh, so the math is unchanged.
    w_eff_p = jnp.zeros((K_FULL, PAD), jnp.float32).at[:, :N_CONV].set(w_eff)
    w1_p = jnp.zeros((PAD, PAD), jnp.float32).at[:N_CONV, :N_FC1].set(fc1_w.T)
    w2_p = jnp.zeros((PAD, PAD), jnp.float32).at[:N_FC1, :n_classes].set(fc2_w.T)
    w12 = jnp.stack([w1_p, w2_p])                          # (2, 128, 128)

    b = jnp.zeros((3, PAD), jnp.float32)
    b = b.at[0, :N_CONV].set(conv_b)
    b = b.at[1, :N_FC1].set(fc1_b)
    b = b.at[2, :n_classes].set(fc2_b)
    return w_eff_p, w12, b


def reference_forward(x, raw_params):
    """Pure-JAX reference of the PyTorch forward (conv2 config), f32."""
    conv_w, conv_b, fc1_w, fc1_b, fc2_w, fc2_b = raw_params
    B = x.shape[0]
    pooled = x.reshape(B, C_IN, 5, 2, 5, 2).mean(axis=(3, 5))       # AvgPool2d(2)
    h = jnp.tanh(pooled.reshape(B, -1) @ conv_w.reshape(N_CONV, -1).T + conv_b)
    h = jnp.tanh(h @ fc1_w.T + fc1_b)                               # Linear + Tanh
    return h @ fc2_w.T + fc2_b                                      # Linear


if __name__ == "__main__":
    key = jax.random.PRNGKey(0)
    kx, kx2, kp = jax.random.split(key, 3)

    n_classes = 10
    raw = init_raw_params(kp, n_classes=n_classes)
    kparams = prepare_kernel_params(raw)

    # Small case (B=2): single grid step, block shapes equal full array dims.
    B = 2
    x = jax.random.normal(kx, (B, C_IN, H_IN, W_IN), dtype=jnp.float32)
    logits = jax.block_until_ready(lenet5_b_conv2_forward(x, kparams, n_classes))
    ref = reference_forward(x, raw)
    assert logits.shape == (B, n_classes)
    assert jnp.allclose(logits, ref, atol=1e-4, rtol=1e-4), "mismatch vs reference (B=2)"

    # Larger case exercising the tiled, pipelined, parallel-batch path.
    B2 = 64
    x_big = jax.random.normal(kx2, (B2, C_IN, H_IN, W_IN), dtype=jnp.float32)
    logits_big = jax.block_until_ready(
        lenet5_b_conv2_forward(x_big, kparams, n_classes, tb=8))
    ref_big = reference_forward(x_big, raw)
    assert logits_big.shape == (B2, n_classes)
    assert jnp.allclose(logits_big, ref_big, atol=1e-4, rtol=1e-4), \
        "mismatch vs reference (B=64)"

    print("KERNEL_OK")
</pallas_src>

<mosaic_0001>
module attributes {stable_mosaic.version = 11 : i64} {
  func.func @_lenet5b_kernel(%arg0: i32, %arg1: memref<2x1600xf32, #tpu.memory_space<vmem>>, %arg2: memref<1600x128xf32, #tpu.memory_space<vmem>>, %arg3: memref<2x128x128xf32, #tpu.memory_space<vmem>>, %arg4: memref<3x128xf32, #tpu.memory_space<vmem>>, %arg5: memref<2x128xf32, #tpu.memory_space<vmem>>) attributes {dimension_semantics = [#tpu.dimension_semantics<parallel>], iteration_bounds = array<i64: 1>, scalar_prefetch = 0 : i64, scratch_operands = 0 : i64, tpu.core_type = #tpu.core_type<tc>, window_params = [{transform_indices = @transform_0, window_bounds = array<i64: 2, 1600>}, {pipeline_mode = #tpu.pipeline_mode<synchronous>, transform_indices = @transform_1, window_bounds = array<i64: 1600, 128>}, {pipeline_mode = #tpu.pipeline_mode<synchronous>, transform_indices = @transform_2, window_bounds = array<i64: 2, 128, 128>}, {pipeline_mode = #tpu.pipeline_mode<synchronous>, transform_indices = @transform_3, window_bounds = array<i64: 3, 128>}, {transform_indices = @transform_4, window_bounds = array<i64: 2, 128>}]} {
    %c0 = arith.constant 0 : index
    %c0_0 = arith.constant 0 : index
    %0 = vector.load %arg1[%c0, %c0_0] : memref<2x1600xf32, #tpu.memory_space<vmem>>, vector<2x1600xf32>
    %c0_1 = arith.constant 0 : index
    %c0_2 = arith.constant 0 : index
    %1 = vector.load %arg2[%c0_1, %c0_2] : memref<1600x128xf32, #tpu.memory_space<vmem>>, vector<1600x128xf32>
    %cst = arith.constant dense<0.000000e+00> : vector<2x128xf32>
    %2 = tpu.matmul %0, %1, %cst {dimension_numbers = #tpu.dot_dimension_numbers<[1], [0], [0], [1], [0, 0, 1, 1], [], []>} : vector<2x1600xf32>, vector<1600x128xf32>, vector<2x128xf32> -> vector<2x128xf32>
    %c0_3 = arith.constant 0 : index
    %c0_4 = arith.constant 0 : index
    %3 = vector.load %arg4[%c0_3, %c0_4] : memref<3x128xf32, #tpu.memory_space<vmem>>, vector<1x128xf32>
    %4 = vector.broadcast %3 : vector<1x128xf32> to vector<2x128xf32>
    %5 = arith.addf %2, %4 : vector<2x128xf32>
    %6 = math.tanh %5 : vector<2x128xf32>
    %c0_5 = arith.constant 0 : index
    %c0_6 = arith.constant 0 : index
    %c0_7 = arith.constant 0 : index
    %7 = vector.load %arg3[%c0_5, %c0_6, %c0_7] : memref<2x128x128xf32, #tpu.memory_space<vmem>>, vector<1x128x128xf32>
    %8 = vector.shape_cast %7 : vector<1x128x128xf32> to vector<128x128xf32>
    %cst_8 = arith.constant dense<0.000000e+00> : vector<2x128xf32>
    %9 = tpu.matmul %6, %8, %cst_8 {dimension_numbers = #tpu.dot_dimension_numbers<[1], [0], [0], [1], [0, 0, 1, 1], [], []>} : vector<2x128xf32>, vector<128x128xf32>, vector<2x128xf32> -> vector<2x128xf32>
    %c1 = arith.constant 1 : index
    %c0_9 = arith.constant 0 : index
    %10 = vector.load %arg4[%c1, %c0_9] : memref<3x128xf32, #tpu.memory_space<vmem>>, vector<1x128xf32>
    %11 = vector.broadcast %10 : vector<1x128xf32> to vector<2x128xf32>
    %12 = arith.addf %9, %11 : vector<2x128xf32>
    %13 = math.tanh %12 : vector<2x128xf32>
    %c1_10 = arith.constant 1 : index
    %c0_11 = arith.constant 0 : index
    %c0_12 = arith.constant 0 : index
    %14 = vector.load %arg3[%c1_10, %c0_11, %c0_12] : memref<2x128x128xf32, #tpu.memory_space<vmem>>, vector<1x128x128xf32>
    %15 = vector.shape_cast %14 : vector<1x128x128xf32> to vector<128x128xf32>
    %cst_13 = arith.constant dense<0.000000e+00> : vector<2x128xf32>
    %16 = tpu.matmul %13, %15, %cst_13 {dimension_numbers = #tpu.dot_dimension_numbers<[1], [0], [0], [1], [0, 0, 1, 1], [], []>} : vector<2x128xf32>, vector<128x128xf32>, vector<2x128xf32> -> vector<2x128xf32>
    %c2 = arith.constant 2 : index
    %c0_14 = arith.constant 0 : index
    %17 = vector.load %arg4[%c2, %c0_14] : memref<3x128xf32, #tpu.memory_space<vmem>>, vector<1x128xf32>
    %18 = vector.broadcast %17 : vector<1x128xf32> to vector<2x128xf32>
    %19 = arith.addf %16, %18 : vector<2x128xf32>
    %c0_15 = arith.constant 0 : index
    %c0_16 = arith.constant 0 : index
    %20 = vector.load %arg5[%c0_15, %c0_16] : memref<2x128xf32, #tpu.memory_space<vmem>>, vector<2x128xf32>
    tpu.vector_store %arg5[%c0_15, %c0_16], %19 {strides = array<i32>} : memref<2x128xf32, #tpu.memory_space<vmem>>, vector<2x128xf32>,
    return
  }
  func.func @transform_0(%arg0: i32) -> (i32, i32) {
    %c0_i32 = arith.constant 0 : i32
    %c0_i32_0 = arith.constant 0 : i32
    return %arg0, %c0_i32 : i32, i32
  }
  func.func @transform_1(%arg0: i32) -> (i32, i32) {
    %c0_i32 = arith.constant 0 : i32
    %c0_i32_0 = arith.constant 0 : i32
    %c0_i32_1 = arith.constant 0 : i32
    return %c0_i32, %c0_i32_0 : i32, i32
  }
  func.func @transform_2(%arg0: i32) -> (i32, i32, i32) {
    %c0_i32 = arith.constant 0 : i32
    %c0_i32_0 = arith.constant 0 : i32
    %c0_i32_1 = arith.constant 0 : i32
    %c0_i32_2 = arith.constant 0 : i32
    return %c0_i32, %c0_i32_0, %c0_i32_1 : i32, i32, i32
  }
  func.func @transform_3(%arg0: i32) -> (i32, i32) {
    %c0_i32 = arith.constant 0 : i32
    %c0_i32_0 = arith.constant 0 : i32
    %c0_i32_1 = arith.constant 0 : i32
    return %c0_i32, %c0_i32_0 : i32, i32
  }
  func.func @transform_4(%arg0: i32) -> (i32, i32) {
    %c0_i32 = arith.constant 0 : i32
    %c0_i32_0 = arith.constant 0 : i32
    return %arg0, %c0_i32 : i32, i32
  }
}

</mosaic_0001>

<bundles_post_ra>
// kernel: tpu_custom_call.1
= control target key start
LH: loop header
LB: loop body
LE: loop exit
PB: predicated region body
PF: predicated region fallthrough
CT: control target
= control target key end

     0   :  { %9 = vsyncpa [#allocation3], 0  ;;  %s890_s0 = inlined_call_operand.hbm [shape: f32[2,1600], index: 0, kind: input, shape index: {}]   ;;  %s891_s1 = inlined_call_operand.hbm [shape: f32[1600,128], index: 1, kind: input, shape index: {}]   ;;  %s892_s2 = inlined_call_operand.hbm [shape: f32[2,128,128], index: 2, kind: input, shape index: {}]   ;;  %s893_s3 = inlined_call_operand.hbm [shape: f32[3,128], index: 3, kind: input, shape index: {}]   ;;  %s894_s4 = inlined_call_operand.hbm [shape: f32[2,128], index: 4, kind: output, shape index: {}]  }
   0x1   :  { %10 = vsyncpa [#allocation6], 0 }
   0x2   :  { %11 = vsyncpa [#allocation9], 0  ;;  %s28_s17 = sshll.u32 %s891_s1, 4  ;;  %s29_s17 = int_to_ptr.hbm [resolvable:$true] %s28_s17 }
   0x3   :  { %12 = vsyncpa [#allocation4], 0  ;;  %s822_s18 = smov [#allocation5]   ;;  %s18_s22 = sshll.u32 %s890_s0, 4  ;;  %s19_s22 = int_to_ptr.hbm [resolvable:$true] %s18_s22 }
   0x4   :  { %s30_s19 = sshll.u32 %s822_s18, 4  ;;  %s823_s23 = smov 128   ;;  %s31_s19 = int_to_ptr.vmem [resolvable:$true] %s30_s19 }
   0x5   :  { %s824_s24 = smov 8   ;;  %s825_s25 = smov [#allocation2]  }
   0x6   :  { %36 = dma.hbm_to_vmem [thread:$0]  %s29_s17, 25600, %s31_s19, [#allocation6], %s823_s23, %s823_s23, %s824_s24  }
   0x7   :  { %s20_s26 = sshll.u32 %s825_s25, 4  ;;  %s41_s29 = sshll.u32 %s892_s2, 4  ;;  %s21_s26 = int_to_ptr.vmem [resolvable:$true] %s20_s26  ;;  %s42_s29 = int_to_ptr.hbm [resolvable:$true] %s41_s29 }
   0x8   :  { %23 = dma.hbm_to_vmem [thread:$0]  %s19_s22, 416, %s21_s26, [#allocation3]  }
   0x9   :  { %s55_s5 = sshll.u32 %s893_s3, 4  ;;  %s826_s6 = smov [#allocation7]   ;;  %s56_s5 = int_to_ptr.hbm [resolvable:$true] %s55_s5 }
   0xa   :  { %s43_s7 = sshll.u32 %s826_s6, 4  ;;  %s827_s0 = smov [#allocation8]   ;;  %s44_s7 = int_to_ptr.vmem [resolvable:$true] %s43_s7 }
   0xb   :  { %49 = dma.hbm_to_vmem [thread:$0]  %s42_s29, 4096, %s44_s7, [#allocation6], %s823_s23, %s823_s23, %s824_s24  }
   0xc   :  { %s57_s8 = sshll.u32 %s827_s0, 4  ;;  %s58_s8 = int_to_ptr.vmem [resolvable:$true] %s57_s8 }
   0xd   :  { %60 = dma.hbm_to_vmem [thread:$0]  %s56_s5, 64, %s58_s8, [#allocation9]  }
   0xe   :  { %814 = dma.done.wait [#allocation3], 416  }
   0xf   :  { %815 = vsyncadd [#allocation3], 4294966880 }
  0x10   :  { %816 = dma.done.wait [#allocation6], 29696  }
  0x11   :  { %817 = vsyncadd [#allocation6], 4294937600 }
  0x12   :  { %818 = dma.done.wait [#allocation9], 64  }
  0x13   :  { %819 = vsyncadd [#allocation9], 4294967232  ;;  %v96_v0 = vld [vmem:[#allocation5 + $0x78] sm:$0xff]  ;;  %v95_v2 = vld [vmem:[#allocation5 + $0x70] sm:$0xff]  ;;  %vm317_vm0 = vcmask 523264   ;;  %s828_s2 = smov [#allocation10]  }
  0x14   :  { %v128_v1 = vld [vmem:[#allocation5 + $0x178] sm:$0xff]  ;;  %320 = vmatpush.msra.mxu0 %v96_v0  ;;  %v127_v4 = vld [vmem:[#allocation5 + $0x170] sm:$0xff]  ;;  %v94_v6 = vld [vmem:[#allocation5 + $0x68] sm:$0xff]  ;;  %s665_s3 = sshll.u32 %s828_s2, 4  ;;  %s667_s11 = sshll.u32 %s894_s4, 4  ;;  %s666_s3 = int_to_ptr.vmem [resolvable:$true] %s665_s3  ;;  %s668_s11 = int_to_ptr.hbm [resolvable:$true] %s667_s11 }
  0x15   :  { %360 = vmatpush.msra.mxu2 %v128_v1  ;;  %v112_v3 = vld [vmem:[#allocation5 + $0xf8] sm:$0xff]  ;;  %v111_v7 = vld [vmem:[#allocation5 + $0xf0] sm:$0xff]  ;;  %v126_v8 = vld [vmem:[#allocation5 + $0x168] sm:$0xff] }
  0x16   :  { %v144_v5 = vld [vmem:[#allocation5 + $0x1f8] sm:$0xff]  ;;  %340 = vmatpush.msra.mxu1 %v112_v3  ;;  %321 = vmatpush.msra.mxu0 %v95_v2  ;;  %v143_v9 = vld [vmem:[#allocation5 + $0x1f0] sm:$0xff]  ;;  %v110_v10 = vld [vmem:[#allocation5 + $0xe8] sm:$0xff] }
  0x17   :  { %380 = vmatpush.msra.mxu3 %v144_v5  ;;  %361 = vmatpush.msra.mxu2 %v127_v4  ;;  %v93_v11 = vld [vmem:[#allocation5 + $0x60] sm:$0xff]  ;;  %v142_v13 = vld [vmem:[#allocation5 + $0x1e8] sm:$0xff]  ;;  %v92_v16 = vld [vmem:[#allocation5 + $0x58] sm:$0xff] }
  0x18   :  { %341 = vmatpush.msra.mxu1 %v111_v7  ;;  %v125_v12 = vld [vmem:[#allocation5 + $0x160] sm:$0xff]  ;;  %322 = vmatpush.msra.mxu0 %v94_v6  ;;  %v124_v17 = vld [vmem:[#allocation5 + $0x158] sm:$0xff]  ;;  %v91_v20 = vld [vmem:[#allocation5 + $0x50] sm:$0xff] }
  0x19   :  { %381 = vmatpush.msra.mxu3 %v143_v9  ;;  %362 = vmatpush.msra.mxu2 %v126_v8  ;;  %v109_v14 = vld [vmem:[#allocation5 + $0xe0] sm:$0xff]  ;;  %v108_v18 = vld [vmem:[#allocation5 + $0xd8] sm:$0xff]  ;;  %v123_v21 = vld [vmem:[#allocation5 + $0x150] sm:$0xff] }
  0x1a   :  { %v141_v15 = vld [vmem:[#allocation5 + $0x1e0] sm:$0xff]  ;;  %342 = vmatpush.msra.mxu1 %v110_v10  ;;  %323 = vmatpush.msra.mxu0 %v93_v11  ;;  %v140_v19 = vld [vmem:[#allocation5 + $0x1d8] sm:$0xff]  ;;  %v107_v22 = vld [vmem:[#allocation5 + $0xd0] sm:$0xff] }
  0x1b   :  { %382 = vmatpush.msra.mxu3 %v142_v13  ;;  %363 = vmatpush.msra.mxu2 %v125_v12  ;;  %v139_v23 = vld [vmem:[#allocation5 + $0x1d0] sm:$0xff]  ;;  %v90_v24 = vld [vmem:[#allocation5 + $0x48] sm:$0xff]  ;;  %v89_v28 = vld [vmem:[#allocation5 + $0x40] sm:$0xff] }
  0x1c   :  { %343 = vmatpush.msra.mxu1 %v109_v14  ;;  %324 = vmatpush.msra.mxu0 %v92_v16  ;;  %v122_v25 = vld [vmem:[#allocation5 + $0x148] sm:$0xff]  ;;  %v121_v29 = vld [vmem:[#allocation5 + $0x140] sm:$0xff]  ;;  %v88_v32 = vld [vmem:[#allocation5 + $0x38] sm:$0xff] }
  0x1d   :  { %383 = vmatpush.msra.mxu3 %v141_v15  ;;  %364 = vmatpush.msra.mxu2 %v124_v17  ;;  %v106_v26 = vld [vmem:[#allocation5 + $0xc8] sm:$0xff]  ;;  %v105_v30 = vld [vmem:[#allocation5 + $0xc0] sm:$0xff]  ;;  %v120_v33 = vld [vmem:[#allocation5 + $0x138] sm:$0xff] }
  0x1e   :  { %344 = vmatpush.msra.mxu1 %v108_v18  ;;  %325 = vmatpush.msra.mxu0 %v91_v20  ;;  %v138_v27 = vld [vmem:[#allocation5 + $0x1c8] sm:$0xff]  ;;  %v137_v31 = vld [vmem:[#allocation5 + $0x1c0] sm:$0xff]  ;;  %v104_v34 = vld [vmem:[#allocation5 + $0xb8] sm:$0xff] }
  0x1f   :  { %384 = vmatpush.msra.mxu3 %v140_v19  ;;  %365 = vmatpush.msra.mxu2 %v123_v21  ;;  %v136_v35 = vld [vmem:[#allocation5 + $0x1b8] sm:$0xff]  ;;  %v87_v36 = vld [vmem:[#allocation5 + $0x30] sm:$0xff]  ;;  %v86_v40 = vld [vmem:[#allocation5 + $0x28] sm:$0xff] }
  0x20   :  { %345 = vmatpush.msra.mxu1 %v107_v22  ;;  %326 = vmatpush.msra.mxu0 %v90_v24  ;;  %v119_v37 = vld [vmem:[#allocation5 + $0x130] sm:$0xff]  ;;  %v118_v41 = vld [vmem:[#allocation5 + $0x128] sm:$0xff]  ;;  %v85_v44 = vld [vmem:[#allocation5 + $0x20] sm:$0xff] }
  0x21   :  { %385 = vmatpush.msra.mxu3 %v139_v23  ;;  %366 = vmatpush.msra.mxu2 %v122_v25  ;;  %v103_v38 = vld [vmem:[#allocation5 + $0xb0] sm:$0xff]  ;;  %v102_v42 = vld [vmem:[#allocation5 + $0xa8] sm:$0xff]  ;;  %v117_v45 = vld [vmem:[#allocation5 + $0x120] sm:$0xff] }
  0x22   :  { %346 = vmatpush.msra.mxu1 %v106_v26  ;;  %327 = vmatpush.msra.mxu0 %v89_v28  ;;  %v135_v39 = vld [vmem:[#allocation5 + $0x1b0] sm:$0xff]  ;;  %v134_v43 = vld [vmem:[#allocation5 + $0x1a8] sm:$0xff]  ;;  %v101_v46 = vld [vmem:[#allocation5 + $0xa0] sm:$0xff] }
  0x23   :  { %386 = vmatpush.msra.mxu3 %v138_v27  ;;  %367 = vmatpush.msra.mxu2 %v121_v29  ;;  %v133_v47 = vld [vmem:[#allocation5 + $0x1a0] sm:$0xff]  ;;  %v84_v48 = vld [vmem:[#allocation5 + $0x18] sm:$0xff]  ;;  %v83_v52 = vld [vmem:[#allocation5 + $0x10] sm:$0xff] }
  0x24   :  { %347 = vmatpush.msra.mxu1 %v105_v30  ;;  %328 = vmatpush.msra.mxu0 %v88_v32  ;;  %v116_v49 = vld [vmem:[#allocation5 + $0x118] sm:$0xff]  ;;  %v115_v53 = vld [vmem:[#allocation5 + $0x110] sm:$0xff]  ;;  %v82_v56 = vld [vmem:[#allocation5 + $0x8] sm:$0xff] }
  0x25   :  { %387 = vmatpush.msra.mxu3 %v137_v31  ;;  %368 = vmatpush.msra.mxu2 %v120_v33  ;;  %v100_v50 = vld [vmem:[#allocation5 + $0x98] sm:$0xff]  ;;  %v99_v54 = vld [vmem:[#allocation5 + $0x90] sm:$0xff]  ;;  %v114_v57 = vld [vmem:[#allocation5 + $0x108] sm:$0xff] }
  0x26   :  { %348 = vmatpush.msra.mxu1 %v104_v34  ;;  %329 = vmatpush.msra.mxu0 %v87_v36  ;;  %v132_v51 = vld [vmem:[#allocation5 + $0x198] sm:$0xff]  ;;  %v131_v55 = vld [vmem:[#allocation5 + $0x190] sm:$0xff]  ;;  %v98_v58 = vld [vmem:[#allocation5 + $0x88] sm:$0xff] }
  0x27   :  { %388 = vmatpush.msra.mxu3 %v136_v35  ;;  %369 = vmatpush.msra.mxu2 %v119_v37  ;;  %v130_v59 = vld [vmem:[#allocation5 + $0x188] sm:$0xff]  ;;  %v81_v60 = vld [vmem:[#allocation5] sm:$0xff]  ;;  %v160_v62 = vld [vmem:[#allocation5 + $0x278] sm:$0xff] }
  0x28   :  { %349 = vmatpush.msra.mxu1 %v103_v38  ;;  %330 = vmatpush.msra.mxu0 %v86_v40  ;;  %v113_v61 = vld [vmem:[#allocation5 + $0x100] sm:$0xff]  ;;  %v192_v63 = vld [vmem:[#allocation5 + $0x378] sm:$0xff]  ;;  %v159_v2 = vld [vmem:[#allocation5 + $0x270] sm:$0xff] }
  0x29   :  { %389 = vmatpush.msra.mxu3 %v135_v39  ;;  %370 = vmatpush.msra.mxu2 %v118_v41  ;;  %v97_v0 = vld [vmem:[#allocation5 + $0x80] sm:$0xff]  ;;  %v176_v3 = vld [vmem:[#allocation5 + $0x2f8] sm:$0xff]  ;;  %v191_v4 = vld [vmem:[#allocation5 + $0x370] sm:$0xff] }
  0x2a   :  { %350 = vmatpush.msra.mxu1 %v102_v42  ;;  %331 = vmatpush.msra.mxu0 %v85_v44  ;;  %v129_v1 = vld [vmem:[#allocation5 + $0x180] sm:$0xff]  ;;  %v208_v5 = vld [vmem:[#allocation5 + $0x3f8] sm:$0xff]  ;;  %v158_v6 = vld [vmem:[#allocation5 + $0x268] sm:$0xff] }
  0x2b   :  { %390 = vmatpush.msra.mxu3 %v134_v43  ;;  %371 = vmatpush.msra.mxu2 %v117_v45  ;;  %v175_v7 = vld [vmem:[#allocation5 + $0x2f0] sm:$0xff]  ;;  %v190_v8 = vld [vmem:[#allocation5 + $0x368] sm:$0xff]  ;;  %v157_v10 = vld [vmem:[#allocation5 + $0x260] sm:$0xff] }
  0x2c   :  { %351 = vmatpush.msra.mxu1 %v101_v46  ;;  %332 = vmatpush.msra.mxu0 %v84_v48  ;;  %v207_v9 = vld [vmem:[#allocation5 + $0x3f0] sm:$0xff]  ;;  %v174_v11 = vld [vmem:[#allocation5 + $0x2e8] sm:$0xff]  ;;  %v189_v12 = vld [vmem:[#allocation5 + $0x360] sm:$0xff] }
  0x2d   :  { %391 = vmatpush.msra.mxu3 %v133_v47  ;;  %372 = vmatpush.msra.mxu2 %v116_v49  ;;  %v206_v13 = vld [vmem:[#allocation5 + $0x3e8] sm:$0xff]  ;;  %v156_v14 = vld [vmem:[#allocation5 + $0x258] sm:$0xff]  ;;  %v173_v15 = vld [vmem:[#allocation5 + $0x2e0] sm:$0xff] }
  0x2e   :  { %352 = vmatpush.msra.mxu1 %v100_v50  ;;  %333 = vmatpush.msra.mxu0 %v83_v52  ;;  %v188_v16 = vld [vmem:[#allocation5 + $0x358] sm:$0xff]  ;;  %v205_v17 = vld [vmem:[#allocation5 + $0x3e0] sm:$0xff]  ;;  %v155_v18 = vld [vmem:[#allocation5 + $0x250] sm:$0xff] }
  0x2f   :  { %392 = vmatpush.msra.mxu3 %v132_v51  ;;  %373 = vmatpush.msra.mxu2 %v115_v53  ;;  %v172_v19 = vld [vmem:[#allocation5 + $0x2d8] sm:$0xff]  ;;  %v187_v20 = vld [vmem:[#allocation5 + $0x350] sm:$0xff]  ;;  %v77_v22 = vld [vmem:[#allocation2] sm:$0xff] }
  0x30   :  { %353 = vmatpush.msra.mxu1 %v99_v54  ;;  %334 = vmatpush.msra.mxu0 %v82_v56  ;;  %v204_v21 = vld [vmem:[#allocation5 + $0x3d8] sm:$0xff]  ;;  %v154_v23 = vld [vmem:[#allocation5 + $0x248] sm:$0xff]  ;;  %v171_v24 = vld [vmem:[#allocation5 + $0x2d0] sm:$0xff]  ;;  %287 = vst [vmem:[#allocation1] ss:$4 sm:$0xff] %v77_v22 }
  0x31   :  { %393 = vmatpush.msra.mxu3 %v131_v55  ;;  %374 = vmatpush.msra.mxu2 %v114_v57  ;;  %v186_v25 = vld [vmem:[#allocation5 + $0x348] sm:$0xff]  ;;  %v203_v26 = vld [vmem:[#allocation5 + $0x3d0] sm:$0xff]  ;;  %v153_v27 = vld [vmem:[#allocation5 + $0x240] sm:$0xff] }
  0x32   :  { %354 = vmatpush.msra.mxu1 %v98_v58  ;;  %335 = vmatpush.msra.mxu0 %v81_v60  ;;  %v170_v28 = vld [vmem:[#allocation5 + $0x2c8] sm:$0xff]  ;;  %v185_v29 = vld [vmem:[#allocation5 + $0x340] sm:$0xff]  ;;  %v152_v31 = vld [vmem:[#allocation5 + $0x238] sm:$0xff] }
  0x33   :  { %394 = vmatpush.msra.mxu3 %v130_v59  ;;  %375 = vmatpush.msra.mxu2 %v113_v61  ;;  %v202_v30 = vld [vmem:[#allocation5 + $0x3c8] sm:$0xff]  ;;  %v169_v32 = vld [vmem:[#allocation5 + $0x2c0] sm:$0xff]  ;;  %v184_v33 = vld [vmem:[#allocation5 + $0x338] sm:$0xff] }
  0x34   :  { %400 = vmatpush.msrb.mxu0 %v160_v62  ;;  %355 = vmatpush.msra.mxu1 %v97_v0  ;;  %v201_v34 = vld [vmem:[#allocation5 + $0x3c0] sm:$0xff]  ;;  %v151_v35 = vld [vmem:[#allocation5 + $0x230] sm:$0xff]  ;;  %v168_v36 = vld [vmem:[#allocation5 + $0x2b8] sm:$0xff] }
  0x35   :  { %440 = vmatpush.msrb.mxu2 %v192_v63  ;;  %395 = vmatpush.msra.mxu3 %v129_v1  ;;  %v183_v37 = vld [vmem:[#allocation5 + $0x330] sm:$0xff]  ;;  %v200_v38 = vld [vmem:[#allocation5 + $0x3b8] sm:$0xff]  ;;  %v150_v40 = vld [vmem:[#allocation5 + $0x228] sm:$0xff] }
  0x36   :  { %401 = vmatpush.msrb.mxu0 %v159_v2  ;;  %420 = vmatpush.msrb.mxu1 %v176_v3  ;;  %v78_v39 = vld [vmem:[#allocation2 + $0x8] sm:$0xff]  ;;  %v79_v42 = vld [vmem:[#allocation2 + $0x10] sm:$0xff]  ;;  %v149_v49 = vld [vmem:[#allocation5 + $0x220] sm:$0xff] }
  0x37   :  { %441 = vmatpush.msrb.mxu2 %v191_v4  ;;  %460 = vmatpush.msrb.mxu3 %v208_v5  ;;  %v167_v41 = vld [vmem:[#allocation5 + $0x2b0] sm:$0xff]  ;;  %289 = vst [vmem:[#allocation1 + $0x20] ss:$4 sm:$0xff] %v78_v39  ;;  %v182_v43 = vld [vmem:[#allocation5 + $0x328] sm:$0xff]  ;;  %v181_v51 = vld [vmem:[#allocation5 + $0x320] sm:$0xff] }
  0x38   :  { %402 = vmatpush.msrb.mxu0 %v158_v6  ;;  %421 = vmatpush.msrb.mxu1 %v175_v7  ;;  %v292_v44 = vld.sshfl [vmem:[#allocation1 + $0x10] sm:$0xff pattern:$0x73625140]  ;;  %v866_v45 = vld.sshfl [vmem:[#allocation1] sm:$0xff pattern:$0x73625140] }
  0x39   :  { %442 = vmatpush.msrb.mxu2 %v190_v8  ;;  %461 = vmatpush.msrb.mxu3 %v207_v9  ;;  %v868_v46 = vld.sshfl [vmem:[#allocation1 + $0x18] sm:$0xff pattern:$0x73625140]  ;;  %v870_v47 = vld.sshfl [vmem:[#allocation1 + $0x8] sm:$0xff pattern:$0x73625140] }
  0x3a   :  { %403 = vmatpush.msrb.mxu0 %v157_v10  ;;  %422 = vmatpush.msrb.mxu1 %v174_v11  ;;  %v199_v48 = vld [vmem:[#allocation5 + $0x3b0] sm:$0xff]  ;;  %v166_v50 = vld [vmem:[#allocation5 + $0x2a8] sm:$0xff]  ;;  %298 = vst [vmem:[#allocation1] ss:$4 sm:$0xff] %v79_v42  ;;  %v148_v53 = vld [vmem:[#allocation5 + $0x218] sm:$0xff] }
  0x3b   :  { %443 = vmatpush.msrb.mxu2 %v189_v12  ;;  %462 = vmatpush.msrb.mxu3 %v206_v13  ;;  %v198_v52 = vld [vmem:[#allocation5 + $0x3a8] sm:$0xff]  ;;  %v165_v54 = vld [vmem:[#allocation5 + $0x2a0] sm:$0xff]  ;;  %v180_v55 = vld [vmem:[#allocation5 + $0x318] sm:$0xff] }
  0x3c   :  { %404 = vmatpush.msrb.mxu0 %v156_v14  ;;  %423 = vmatpush.msrb.mxu1 %v173_v15  ;;  %v197_v56 = vld [vmem:[#allocation5 + $0x3a0] sm:$0xff]  ;;  %v147_v57 = vld [vmem:[#allocation5 + $0x210] sm:$0xff]  ;;  %v164_v58 = vld [vmem:[#allocation5 + $0x298] sm:$0xff] }
  0x3d   :  { %444 = vmatpush.msrb.mxu2 %v188_v16  ;;  %463 = vmatpush.msrb.mxu3 %v205_v17  ;;  %v80_v59 = vld [vmem:[#allocation2 + $0x18] sm:$0x3]  ;;  %v179_v0 = vld [vmem:[#allocation5 + $0x310] sm:$0xff]  ;;  %v146_v2 = vld [vmem:[#allocation5 + $0x208] sm:$0xff] }
  0x3e   :  { %405 = vmatpush.msrb.mxu0 %v155_v18  ;;  %424 = vmatpush.msrb.mxu1 %v172_v19  ;;  %v872_v60 = vld.sshfl [vmem:[#allocation1 + $0x30] sm:$0xff pattern:$0x73625140]  ;;  %v874_v61 = vld.sshfl [vmem:[#allocation1 + $0x20] sm:$0xff pattern:$0x73625140] }
  0x3f   :  { %445 = vmatpush.msrb.mxu2 %v187_v20  ;;  %464 = vmatpush.msrb.mxu3 %v204_v21  ;;  %v876_v62 = vld.sshfl [vmem:[#allocation1 + $0x38] sm:$0xff pattern:$0x73625140]  ;;  %v878_v63 = vld.sshfl [vmem:[#allocation1 + $0x28] sm:$0xff pattern:$0x73625140] }
  0x40   :  { %406 = vmatpush.msrb.mxu0 %v154_v23  ;;  %425 = vmatpush.msrb.mxu1 %v171_v24  ;;  %v196_v1 = vld [vmem:[#allocation5 + $0x398] sm:$0xff]  ;;  %299 = vst [vmem:[#allocation1 + $0x20] ss:$4 sm:$0xff] %v80_v59  ;;  %v163_v3 = vld [vmem:[#allocation5 + $0x290] sm:$0xff]  ;;  %v178_v4 = vld [vmem:[#allocation5 + $0x308] sm:$0xff] }
  0x41   :  { %446 = vmatpush.msrb.mxu2 %v186_v25  ;;  %465 = vmatpush.msrb.mxu3 %v203_v26  ;;  %v195_v5 = vld [vmem:[#allocation5 + $0x390] sm:$0xff]  ;;  %v145_v6 = vld [vmem:[#allocation5 + $0x200] sm:$0xff]  ;;  %v162_v7 = vld [vmem:[#allocation5 + $0x288] sm:$0xff] }
  0x42   :  { %407 = vmatpush.msrb.mxu0 %v153_v27  ;;  %426 = vmatpush.msrb.mxu1 %v170_v28  ;;  %v177_v8 = vld [vmem:[#allocation5 + $0x300] sm:$0xff]  ;;  %v194_v9 = vld [vmem:[#allocation5 + $0x388] sm:$0xff]  ;;  %v224_v10 = vld [vmem:[#allocation5 + $0x478] sm:$0xff] }
  0x43   :  { %447 = vmatpush.msrb.mxu2 %v185_v29  ;;  %466 = vmatpush.msrb.mxu3 %v202_v30  ;;  %v256_v11 = vld [vmem:[#allocation5 + $0x578] sm:$0xff]  ;;  %v161_v12 = vld [vmem:[#allocation5 + $0x280] sm:$0xff]  ;;  %v223_v14 = vld [vmem:[#allocation5 + $0x470] sm:$0xff] }
  0x44   :  { %408 = vmatpush.msrb.mxu0 %v152_v31  ;;  %427 = vmatpush.msrb.mxu1 %v169_v32  ;;  %v193_v13 = vld [vmem:[#allocation5 + $0x380] sm:$0xff]  ;;  %v240_v15 = vld [vmem:[#allocation5 + $0x4f8] sm:$0xff]  ;;  %v255_v16 = vld [vmem:[#allocation5 + $0x570] sm:$0xff] }
  0x45   :  { %448 = vmatpush.msrb.mxu2 %v184_v33  ;;  %467 = vmatpush.msrb.mxu3 %v201_v34  ;;  %v272_v17 = vld [vmem:[#allocation5 + $0x5f8] sm:$0xff]  ;;  %v222_v18 = vld [vmem:[#allocation5 + $0x468] sm:$0xff]  ;;  %v239_v19 = vld [vmem:[#allocation5 + $0x4f0] sm:$0xff] }
  0x46   :  { %409 = vmatpush.msrb.mxu0 %v151_v35  ;;  %428 = vmatpush.msrb.mxu1 %v168_v36  ;;  %v254_v20 = vld [vmem:[#allocation5 + $0x568] sm:$0xff]  ;;  %v271_v21 = vld [vmem:[#allocation5 + $0x5f0] sm:$0xff]  ;;  %v221_v22 = vld [vmem:[#allocation5 + $0x460] sm:$0xff] }
  0x47   :  { %449 = vmatpush.msrb.mxu2 %v183_v37  ;;  %468 = vmatpush.msrb.mxu3 %v200_v38  ;;  %v238_v23 = vld [vmem:[#allocation5 + $0x4e8] sm:$0xff]  ;;  %v253_v24 = vld [vmem:[#allocation5 + $0x560] sm:$0xff]  ;;  %v220_v26 = vld [vmem:[#allocation5 + $0x458] sm:$0xff] }
  0x48   :  { %410 = vmatpush.msrb.mxu0 %v150_v40  ;;  %429 = vmatpush.msrb.mxu1 %v167_v41  ;;  %v270_v25 = vld [vmem:[#allocation5 + $0x5e8] sm:$0xff]  ;;  %v237_v27 = vld [vmem:[#allocation5 + $0x4e0] sm:$0xff]  ;;  %v252_v28 = vld [vmem:[#allocation5 + $0x558] sm:$0xff] }
  0x49   :  { %450 = vmatpush.msrb.mxu2 %v182_v43  ;;  %469 = vmatpush.msrb.mxu3 %v199_v48  ;;  %v269_v29 = vld [vmem:[#allocation5 + $0x5e0] sm:$0xff]  ;;  %v219_v30 = vld [vmem:[#allocation5 + $0x450] sm:$0xff]  ;;  %v236_v31 = vld [vmem:[#allocation5 + $0x4d8] sm:$0xff] }
  0x4a   :  { %411 = vmatpush.msrb.mxu0 %v149_v49  ;;  %430 = vmatpush.msrb.mxu1 %v166_v50  ;;  %v251_v32 = vld [vmem:[#allocation5 + $0x550] sm:$0xff]  ;;  %v268_v33 = vld [vmem:[#allocation5 + $0x5d8] sm:$0xff]  ;;  %v218_v34 = vld [vmem:[#allocation5 + $0x448] sm:$0xff] }
  0x4b   :  { %451 = vmatpush.msrb.mxu2 %v181_v51  ;;  %470 = vmatpush.msrb.mxu3 %v198_v52  ;;  %v235_v35 = vld [vmem:[#allocation5 + $0x4d0] sm:$0xff]  ;;  %v250_v36 = vld [vmem:[#allocation5 + $0x548] sm:$0xff]  ;;  %v217_v38 = vld [vmem:[#allocation5 + $0x440] sm:$0xff] }
  0x4c   :  { %412 = vmatpush.msrb.mxu0 %v148_v53  ;;  %431 = vmatpush.msrb.mxu1 %v165_v54  ;;  %v267_v37 = vld [vmem:[#allocation5 + $0x5d0] sm:$0xff]  ;;  %v234_v39 = vld [vmem:[#allocation5 + $0x4c8] sm:$0xff]  ;;  %v249_v40 = vld [vmem:[#allocation5 + $0x540] sm:$0xff] }
  0x4d   :  { %452 = vmatpush.msrb.mxu2 %v180_v55  ;;  %471 = vmatpush.msrb.mxu3 %v197_v56  ;;  %v266_v41 = vld [vmem:[#allocation5 + $0x5c8] sm:$0xff]  ;;  %v216_v42 = vld [vmem:[#allocation5 + $0x438] sm:$0xff]  ;;  %v233_v43 = vld [vmem:[#allocation5 + $0x4c0] sm:$0xff] }
  0x4e   :  { %413 = vmatpush.msrb.mxu0 %v147_v57  ;;  %432 = vmatpush.msrb.mxu1 %v164_v58  ;;  %v247_v48 = vld [vmem:[#allocation5 + $0x530] sm:$0xff]  ;;  %v264_v49 = vld [vmem:[#allocation5 + $0x5b8] sm:$0xff]  ;;  %v214_v50 = vld [vmem:[#allocation5 + $0x428] sm:$0xff] }
  0x4f   :  { %453 = vmatpush.msrb.mxu2 %v179_v0  ;;  %472 = vmatpush.msrb.mxu3 %v196_v1  ;;  %v231_v51 = vld [vmem:[#allocation5 + $0x4b0] sm:$0xff]  ;;  %v246_v52 = vld [vmem:[#allocation5 + $0x528] sm:$0xff]  ;;  %v213_v54 = vld [vmem:[#allocation5 + $0x420] sm:$0xff] }
  0x50   :  { %414 = vmatpush.msrb.mxu0 %v146_v2  ;;  %433 = vmatpush.msrb.mxu1 %v163_v3  ;;  %v263_v53 = vld [vmem:[#allocation5 + $0x5b0] sm:$0xff]  ;;  %v230_v55 = vld [vmem:[#allocation5 + $0x4a8] sm:$0xff]  ;;  %v245_v56 = vld [vmem:[#allocation5 + $0x520] sm:$0xff] }
  0x51   :  { %454 = vmatpush.msrb.mxu2 %v178_v4  ;;  %473 = vmatpush.msrb.mxu3 %v195_v5  ;;  %v262_v57 = vld [vmem:[#allocation5 + $0x5a8] sm:$0xff]  ;;  %v212_v58 = vld [vmem:[#allocation5 + $0x418] sm:$0xff]  ;;  %v229_v59 = vld [vmem:[#allocation5 + $0x4a0] sm:$0xff] }
  0x52   :  { %376 = vmatmul.f32.vlgmr.msra.gmra.mxu2 %v292_v44  ;;  %415 = vmatpush.msrb.mxu0 %v145_v6  ;;  %v248_v44 = vld [vmem:[#allocation5 + $0x538] sm:$0xff]  ;;  %v243_v0 = vld [vmem:[#allocation5 + $0x510] sm:$0xff]  ;;  %v210_v2 = vld [vmem:[#allocation5 + $0x408] sm:$0xff] }
  0x53   :  { %434 = vmatpush.msrb.mxu1 %v162_v7  ;;  %455 = vmatpush.msrb.mxu2 %v177_v8  ;;  %v260_v1 = vld [vmem:[#allocation5 + $0x598] sm:$0xff]  ;;  %v227_v3 = vld [vmem:[#allocation5 + $0x490] sm:$0xff]  ;;  %v242_v4 = vld [vmem:[#allocation5 + $0x508] sm:$0xff] }
  0x54   :  { %474 = vmatpush.msrb.mxu3 %v194_v9  ;;  %336 = vmatmul.f32.vlgmr.msra.gmra.mxu0 %v866_v45  ;;  %v265_v45 = vld [vmem:[#allocation5 + $0x5c0] sm:$0xff]  ;;  %v259_v5 = vld [vmem:[#allocation5 + $0x590] sm:$0xff]  ;;  %v226_v7 = vld [vmem:[#allocation5 + $0x488] sm:$0xff] }
  0x55   :  { %396 = vmatmul.f32.vlgmr.msra.gmra.mxu3 %v868_v46  ;;  %480 = vmatpush.msra.mxu0 %v224_v10  ;;  %v215_v46 = vld [vmem:[#allocation5 + $0x430] sm:$0xff]  ;;  %v209_v6 = vld [vmem:[#allocation5 + $0x400] sm:$0xff]  ;;  %v258_v9 = vld [vmem:[#allocation5 + $0x588] sm:$0xff] }
  0x56   :  { %520 = vmatpush.msra.mxu2 %v256_v11  ;;  %435 = vmatpush.msrb.mxu1 %v161_v12  ;;  %v241_v8 = vld [vmem:[#allocation5 + $0x500] sm:$0xff]  ;;  %v302_v11 = vld.sshfl [vmem:[#allocation1 + $0x10] sm:$0xff pattern:$0x73625140]  ;;  %v280_v12 = vld [vmem:[#allocation5 + $0x638] sm:$0xff] }
  0x57   :  { %475 = vmatpush.msrb.mxu3 %v193_v13  ;;  %356 = vmatmul.f32.vlgmr.msra.gmra.mxu1 %v870_v47  ;;  %v232_v47 = vld [vmem:[#allocation5 + $0x4b8] sm:$0xff]  ;;  %v225_v13 = vld [vmem:[#allocation5 + $0x480] sm:$0xff] }
  0x58   :  { %481 = vmatpush.msra.mxu0 %v223_v14  ;;  %500 = vmatpush.msra.mxu1 %v240_v15  ;;  %v300_v10 = vld.sshfl [vmem:[#allocation1] sm:$0xff pattern:$0x73625140]  ;;  %v301_v15 = vld.sshfl [vmem:[#allocation1 + $0x8] sm:$0xff pattern:$0x73625140] }
  0x59   :  { %521 = vmatpush.msra.mxu2 %v255_v16  ;;  %540 = vmatpush.msra.mxu3 %v272_v17  ;;  %v257_v14 = vld [vmem:[#allocation5 + $0x580] sm:$0xff]  ;;  %v303_v16 = vld.sshfl [vmem:[#allocation1 + $0x18] sm:$0xff pattern:$0x73625140] }
  0x5a   :  { %482 = vmatpush.msra.mxu0 %v222_v18  ;;  %501 = vmatpush.msra.mxu1 %v239_v19  ;;  %v279_v17 = vld [vmem:[#allocation5 + $0x630] sm:$0xff]  ;;  %v278_v18 = vld [vmem:[#allocation5 + $0x628] sm:$0xff]  ;;  %v277_v19 = vld [vmem:[#allocation5 + $0x620] sm:$0xff] }
  0x5b   :  { %522 = vmatpush.msra.mxu2 %v254_v20  ;;  %541 = vmatpush.msra.mxu3 %v271_v21  ;;  %v276_v20 = vld [vmem:[#allocation5 + $0x618] sm:$0xff]  ;;  %v275_v21 = vld [vmem:[#allocation5 + $0x610] sm:$0xff] }
  0x5c   :  { %456 = vmatmul.f32.vlgmr.msrb.gmra.mxu2 %v872_v60  ;;  %483 = vmatpush.msra.mxu0 %v221_v22  ;;  %v244_v60 = vld [vmem:[#allocation5 + $0x518] sm:$0xff]  ;;  %v274_v22 = vld [vmem:[#allocation5 + $0x608] sm:$0xff] }
  0x5d   :  { %502 = vmatpush.msra.mxu1 %v238_v23  ;;  %523 = vmatpush.msra.mxu2 %v253_v24  ;;  %v273_v23 = vld [vmem:[#allocation5 + $0x600] sm:$0xff] }
  0x5e   :  { %542 = vmatpush.msra.mxu3 %v270_v25  ;;  %416 = vmatmul.f32.vlgmr.msrb.gmra.mxu0 %v874_v61  ;;  %v261_v61 = vld [vmem:[#allocation5 + $0x5a0] sm:$0xff]  ;;  %v596_v25 = vld [vmem:[#allocation7 + $0x78] sm:$0xff] }
  0x5f   :  { %476 = vmatmul.f32.vlgmr.msrb.gmra.mxu3 %v876_v62  ;;  %484 = vmatpush.msra.mxu0 %v220_v26  ;;  %v211_v62 = vld [vmem:[#allocation5 + $0x410] sm:$0xff]  ;;  %v304_v24 = vld.sshfl [vmem:[#allocation1 + $0x20] sm:$0xff pattern:$0x73625140] }
  0x60   :  { %503 = vmatpush.msra.mxu1 %v237_v27  ;;  %524 = vmatpush.msra.mxu2 %v252_v28  ;;  %v595_v26 = vld [vmem:[#allocation7 + $0x70] sm:$0xff]  ;;  %v594_v27 = vld [vmem:[#allocation7 + $0x68] sm:$0xff]  ;;  %v593_v28 = vld [vmem:[#allocation7 + $0x60] sm:$0xff] }
  0x61   :  { %543 = vmatpush.msra.mxu3 %v269_v29  ;;  %436 = vmatmul.f32.vlgmr.msrb.gmra.mxu1 %v878_v63  ;;  %v228_v63 = vld [vmem:[#allocation5 + $0x498] sm:$0xff] }
  0x62   :  { %485 = vmatpush.msra.mxu0 %v219_v30  ;;  %504 = vmatpush.msra.mxu1 %v236_v31  ;;  %v592_v29 = vld [vmem:[#allocation7 + $0x58] sm:$0xff]  ;;  %v687_v30 = vld [vmem:[#allocation8] ss:$0 sm:$0xff]  ;;  %v591_v31 = vld [vmem:[#allocation7 + $0x50] sm:$0xff] }
  0x63   :  { %525 = vmatpush.msra.mxu2 %v251_v32  ;;  %544 = vmatpush.msra.mxu3 %v268_v33  ;;  %v590_v33 = vld [vmem:[#allocation7 + $0x48] sm:$0xff] }
  0x64   :  { %486 = vmatpush.msra.mxu0 %v218_v34  ;;  %505 = vmatpush.msra.mxu1 %v235_v35 }
  0x65   :  { %526 = vmatpush.msra.mxu2 %v250_v36  ;;  %545 = vmatpush.msra.mxu3 %v267_v37  ;;  %v589_v36 = vld [vmem:[#allocation7 + $0x40] sm:$0xff]  ;;  %v588_v37 = vld [vmem:[#allocation7 + $0x38] sm:$0xff] }
  0x66   :  { %487 = vmatpush.msra.mxu0 %v217_v38  ;;  %506 = vmatpush.msra.mxu1 %v234_v39  ;;  %v587_v38 = vld [vmem:[#allocation7 + $0x30] sm:$0xff] }
  0x67   :  { %527 = vmatpush.msra.mxu2 %v249_v40  ;;  %546 = vmatpush.msra.mxu3 %v266_v41  ;;  %v586_v41 = vld [vmem:[#allocation7 + $0x28] sm:$0xff] }
  0x68   :  { %488 = vmatpush.msra.mxu0 %v216_v42  ;;  %507 = vmatpush.msra.mxu1 %v233_v43 }
  0x69   :  { %528 = vmatpush.msra.mxu2 %v248_v44  ;;  %547 = vmatpush.msra.mxu3 %v265_v45  ;;  %v585_v44 = vld [vmem:[#allocation7 + $0x20] sm:$0xff]  ;;  %v584_v45 = vld [vmem:[#allocation7 + $0x18] sm:$0xff] }
  0x6a   :  { %489 = vmatpush.msra.mxu0 %v215_v46  ;;  %508 = vmatpush.msra.mxu1 %v232_v47  ;;  %v583_v47 = vld [vmem:[#allocation7 + $0x10] sm:$0xff] }
  0x6b   :  { %529 = vmatpush.msra.mxu2 %v247_v48  ;;  %548 = vmatpush.msra.mxu3 %v264_v49  ;;  %v582_v49 = vld [vmem:[#allocation7 + $0x8] sm:$0xff] }
  0x6c   :  { %490 = vmatpush.msra.mxu0 %v214_v50  ;;  %509 = vmatpush.msra.mxu1 %v231_v51  ;;  %v581_v50 = vld [vmem:[#allocation7] sm:$0xff] }
  0x6d   :  { %530 = vmatpush.msra.mxu2 %v246_v52  ;;  %549 = vmatpush.msra.mxu3 %v263_v53  ;;  %v636_v53 = vld [vmem:[#allocation7 + $0xf8] sm:$0xff] }
  0x6e   :  { %491 = vmatpush.msra.mxu0 %v213_v54  ;;  %510 = vmatpush.msra.mxu1 %v230_v55  ;;  %v635_v54 = vld [vmem:[#allocation7 + $0xf0] sm:$0xff] }
  0x6f   :  { %531 = vmatpush.msra.mxu2 %v245_v56  ;;  %550 = vmatpush.msra.mxu3 %v262_v57  ;;  %v634_v57 = vld [vmem:[#allocation7 + $0xe8] sm:$0xff] }
  0x70   :  { %492 = vmatpush.msra.mxu0 %v212_v58  ;;  %511 = vmatpush.msra.mxu1 %v229_v59  ;;  %v633_v58 = vld [vmem:[#allocation7 + $0xe0] sm:$0xff] }
  0x71   :  { %532 = vmatpush.msra.mxu2 %v244_v60  ;;  %551 = vmatpush.msra.mxu3 %v261_v61  ;;  %v632_v61 = vld [vmem:[#allocation7 + $0xd8] sm:$0xff] }
  0x72   :  { %493 = vmatpush.msra.mxu0 %v211_v62  ;;  %512 = vmatpush.msra.mxu1 %v228_v63  ;;  %v631_v63 = vld [vmem:[#allocation7 + $0xd0] sm:$0xff] }
  0x73   :  { %533 = vmatpush.msra.mxu2 %v243_v0  ;;  %552 = vmatpush.msra.mxu3 %v260_v1  ;;  %v630_v1 = vld [vmem:[#allocation7 + $0xc8] sm:$0xff] }
  0x74   :  { %494 = vmatpush.msra.mxu0 %v210_v2  ;;  %513 = vmatpush.msra.mxu1 %v227_v3 }
  0x75   :  { %534 = vmatpush.msra.mxu2 %v242_v4  ;;  %553 = vmatpush.msra.mxu3 %v259_v5  ;;  %v629_v4 = vld [vmem:[#allocation7 + $0xc0] sm:$0xff] }
  0x76   :  { %495 = vmatpush.msra.mxu0 %v209_v6  ;;  %514 = vmatpush.msra.mxu1 %v226_v7  ;;  %v628_v6 = vld [vmem:[#allocation7 + $0xb8] sm:$0xff] }
  0x77   :  { %535 = vmatpush.msra.mxu2 %v241_v8  ;;  %554 = vmatpush.msra.mxu3 %v258_v9  ;;  %v627_v8 = vld [vmem:[#allocation7 + $0xb0] sm:$0xff] }
  0x78   :  { %496 = vmatmul.f32.vlgmr.msra.gmra.mxu0 %v300_v10  ;;  %536 = vmatmul.f32.vlgmr.msra.gmra.mxu2 %v302_v11  ;;  %v626_v11 = vld [vmem:[#allocation7 + $0xa8] sm:$0xff] }
  0x79   :  { %568 = vmatpush.msrb.mxu0 %v280_v12  ;;  %515 = vmatpush.msra.mxu1 %v225_v13 }
  0x7a   :  { %555 = vmatpush.msra.mxu3 %v257_v14  ;;  %516 = vmatmul.f32.vlgmr.msra.gmra.mxu1 %v301_v15 }
  0x7b   :  { %556 = vmatmul.f32.vlgmr.msra.gmra.mxu3 %v303_v16  ;;  %569 = vmatpush.msrb.mxu0 %v279_v17  ;;  %v625_v16 = vld [vmem:[#allocation7 + $0xa0] sm:$0xff]  ;;  %v624_v17 = vld [vmem:[#allocation7 + $0x98] sm:$0xff] }
  0x7c   :  { %599 = vmatpush.msrb.mxu1 %v596_v25  ;;  %639 = vmatpush.msrb.mxu2 %v636_v53  ;;  %v689_v25 = vld [vmem:[#allocation8 + $0x2] ss:$0 sm:$0xff] }
  0x7d   :  { %570 = vmatpush.msrb.mxu0 %v278_v18  ;;  %v623_v18 = vld [vmem:[#allocation7 + $0x90] sm:$0xff] }
  0x7e   :  { %600 = vmatpush.msrb.mxu1 %v595_v26  ;;  %640 = vmatpush.msrb.mxu2 %v635_v54 }
  0x7f   :  { %571 = vmatpush.msrb.mxu0 %v277_v19  ;;  %v622_v19 = vld [vmem:[#allocation7 + $0x88] sm:$0xff] }
  0x80   :  { %601 = vmatpush.msrb.mxu1 %v594_v27  ;;  %641 = vmatpush.msrb.mxu2 %v634_v57 }
  0x81   :  { %572 = vmatpush.msrb.mxu0 %v276_v20  ;;  %v621_v20 = vld [vmem:[#allocation7 + $0x80] sm:$0xff] }
  0x82   :  { %602 = vmatpush.msrb.mxu1 %v593_v28  ;;  %642 = vmatpush.msrb.mxu2 %v633_v58 }
  0x83   :  { %573 = vmatpush.msrb.mxu0 %v275_v21  ;;  %v688_v21 = vld [vmem:[#allocation8 + $0x1] ss:$0 sm:$0xff] }
  0x84   :  { %603 = vmatpush.msrb.mxu1 %v592_v29  ;;  %643 = vmatpush.msrb.mxu2 %v632_v61 }
  0x85   :  { %574 = vmatpush.msrb.mxu0 %v274_v22 }
  0x86   :  { %604 = vmatpush.msrb.mxu1 %v591_v31  ;;  %644 = vmatpush.msrb.mxu2 %v631_v63 }
  0x87   :  { %575 = vmatpush.msrb.mxu0 %v273_v23 }
  0x88   :  { %679 = vmatmul.msk.f32.vlgmr.msrb.gmra.mxu0 %vm317_vm0, %v304_v24  ;;  %605 = vmatpush.msrb.mxu1 %v590_v33 }
  0x89   :  { %645 = vmatpush.msrb.mxu2 %v630_v1 }
  0x8a   :  { %606 = vmatpush.msrb.mxu1 %v589_v36 }
  0x8b   :  { %646 = vmatpush.msrb.mxu2 %v629_v4 }
  0x8c   :  { %607 = vmatpush.msrb.mxu1 %v588_v37 }
  0x8d   :  { %647 = vmatpush.msrb.mxu2 %v628_v6 }
  0x8e   :  { %608 = vmatpush.msrb.mxu1 %v587_v38 }
  0x8f   :  { %648 = vmatpush.msrb.mxu2 %v627_v8 }
  0x90   :  { %609 = vmatpush.msrb.mxu1 %v586_v41 }
  0x91   :  { %649 = vmatpush.msrb.mxu2 %v626_v11 }
  0x92   :  { %610 = vmatpush.msrb.mxu1 %v585_v44 }
  0x93   :  { %650 = vmatpush.msrb.mxu2 %v625_v16 }
  0x94   :  { %611 = vmatpush.msrb.mxu1 %v584_v45 }
  0x95   :  { %651 = vmatpush.msrb.mxu2 %v624_v17 }
  0x96   :  { %612 = vmatpush.msrb.mxu1 %v583_v47 }
  0x97   :  { %652 = vmatpush.msrb.mxu2 %v623_v18 }
  0x98   :  { %613 = vmatpush.msrb.mxu1 %v582_v49 }
  0x99   :  { %653 = vmatpush.msrb.mxu2 %v622_v19 }
  0x9a   :  { %614 = vmatpush.msrb.mxu1 %v581_v50 }
  0x9b   :  { %654 = vmatpush.msrb.mxu2 %v621_v20 }
  0xd1   :  { %v337_v32 = vpop.f32.mrf.mxu0 }
  0xd2   :  { %v338_v34 = vadd.f32 %v687_v30, %v337_v32 }
  0xd4   :  { %v357_v35 = vpop.f32.mrf.mxu1 }
  0xd5   :  { %v358_v39 = vadd.f32 %v357_v35, %v338_v34  ;;  %v377_v40 = vpop.f32.mrf.mxu2 }
  0xd7   :  { %v378_v42 = vadd.f32 %v377_v40, %v358_v39 }
  0xd8   :  { %v397_v43 = vpop.f32.mrf.mxu3 }
  0xd9   :  { %v398_v46 = vadd.f32 %v397_v43, %v378_v42 }
  0xdb   :  { %v417_v48 = vpop.f32.mrf.mxu0 }
  0xdc   :  { %v418_v51 = vadd.f32 %v417_v48, %v398_v46 }
  0xde   :  { %v437_v52 = vpop.f32.mrf.mxu1 }
  0xdf   :  { %v438_v55 = vadd.f32 %v437_v52, %v418_v51  ;;  %v457_v56 = vpop.f32.mrf.mxu2 }
  0xe1   :  { %v458_v59 = vadd.f32 %v457_v56, %v438_v55 }
  0xe2   :  { %v477_v60 = vpop.f32.mrf.mxu3 }
  0xe3   :  { %v478_v0 = vadd.f32 %v477_v60, %v458_v59 }
  0xf5   :  { %v497_v62 = vpop.f32.mrf.mxu0 }
  0xf6   :  { %v498_v2 = vadd.f32 %v497_v62, %v478_v0 }
  0xf7   :  { %v517_v3 = vpop.f32.mrf.mxu1 }
  0xf8   :  { %v518_v7 = vadd.f32 %v517_v3, %v498_v2 }
  0xfb   :  { %v537_v5 = vpop.f32.mrf.mxu2 }
  0xfc   :  { %v538_v9 = vadd.f32 %v537_v5, %v518_v7 }
  0xfe   :  { %v557_v10 = vpop.f32.mrf.mxu3 }
  0xff   :  { %v558_v12 = vadd.f32 %v557_v10, %v538_v9 }
 0x105   :  { %v577_v13 = vpop.f32.mrf.mxu0 }
 0x106   :  { %v578_v14 = vadd.f32 %v577_v13, %v558_v12 }
 0x108   :  { %690 = vtanh.f32 %v578_v14 }
 0x10e   :  { %v691_v15 = vpop.eup %690 }
 0x10f   :  { %615 = vmatmul.f32.vlgmr.msrb.gmra.mxu1 %v691_v15 }
 0x18c   :  { %v616_v22 = vpop.f32.mrf.mxu1 }
 0x18d   :  { %v617_v23 = vadd.f32 %v688_v21, %v616_v22 }
 0x18f   :  { %692 = vtanh.f32 %v617_v23 }
 0x195   :  { %v693_v24 = vpop.eup %692 }
 0x196   :  { %655 = vmatmul.f32.vlgmr.msrb.gmra.mxu2 %v693_v24 }
 0x219   :  { %v656_v26 = vpop.f32.mrf.mxu2 }
 0x21a   :  { %v657_v27 = vadd.f32 %v689_v25, %v656_v26 }
 0x21c   :  { %659 = vst [vmem:[#allocation10] sm:$0x3] %v657_v27 }
 0x21d   :  { %670 = dma.vmem_to_hbm [thread:$0]  %s666_s3, 32, %s668_s11, [#allocation4]  }
 0x21e   :  { %820 = dma.done.wait [#allocation4], 32  }
 0x21f   :  { %821 = vsyncadd [#allocation4], 4294967264 }
 0x220   :  { %675 = vsyncpa [#allocation3], 1 }
 0x221   :  { %676 = vsyncpa [#allocation6], 1 }
 0x222   :  { %677 = vsyncpa [#allocation9], 1 }
 0x223   :  { %678 = vsyncpa [#allocation4], 1 }

</bundles_post_ra>
